<compile_context>
chip_gen: v5e
topology: v5e:2x2
jax: 0.10.0
libtpu: 0.0.40
codegen_flags: <defaults>
</compile_context>

<pallas_src>
import functools

import jax
import jax.numpy as jnp
from jax.experimental import pallas as pl
from jax.experimental.pallas import tpu as pltpu


# Lane-axis tile width (logical rows per grid step). 32768 f32 columns ->
# 1 MiB per (4, T) buffer after sublane padding; ~4 MiB total with
# double-buffered input + output -- safe on v5e / v6e / v7x.
_MAX_TILE_COLS = 32768


def _round_up(n, m):
    return ((n + m - 1) // m) * m


def _rmsnorm_kernel(x_ref, g_ref, o_ref, *, d, eps):
    # x_ref: (d, TILE_COLS) block -- rows on the lane axis, features on sublanes.
    x = x_ref[...].astype(jnp.float32)                    # (d, T)
    g = g_ref[...].astype(jnp.float32)                    # (d, 1)  (cast hoisted, once per step)
    ssq = jnp.sum(x * x, axis=0, keepdims=True)           # (1, T)  4-term sublane reduce
    denom = jnp.sqrt(ssq) * (d ** -0.5) + eps             # (1, T)
    inv = pl.reciprocal(denom, approx=True)               # EUP; O(rows), not O(rows*d)
    y = (x * inv) * g                                     # lane / sublane broadcasts on VPU
    o_ref[...] = y.astype(o_ref.dtype)


def rmsnorm(x, gamma, *, eps=1e-10, max_tile_cols=_MAX_TILE_COLS):
    """RMSNorm over the last axis. x: (..., d), gamma: (d,). Returns same shape/dtype."""
    orig_shape = x.shape
    d = orig_shape[-1]
    rows = 1
    for s in orig_shape[:-1]:
        rows *= s

    # Lane-dense layout: (rows, d) -> (d, rows) so rows map to the 128-lane axis.
    xt = x.reshape(rows, d).T                              # (d, rows)
    tile_cols = min(max_tile_cols, _round_up(rows, 128))
    rows_pad = _round_up(rows, tile_cols)
    if rows_pad != rows:
        # Padded zero rows: ssq = 0 -> denom = eps -> output 0; sliced off below.
        xt = jnp.pad(xt, ((0, 0), (0, rows_pad - rows)))
    g2d = gamma.reshape(d, 1)

    grid = (rows_pad // tile_cols,)
    out_t = pl.pallas_call(
        functools.partial(_rmsnorm_kernel, d=d, eps=eps),
        out_shape=jax.ShapeDtypeStruct((d, rows_pad), x.dtype),
        grid=grid,
        in_specs=[
            pl.BlockSpec((d, tile_cols), lambda i: (0, i)),   # x tile, pipelined
            pl.BlockSpec((d, 1), lambda i: (0, 0)),           # gamma, resident
        ],
        out_specs=pl.BlockSpec((d, tile_cols), lambda i: (0, i)),
        compiler_params=pltpu.CompilerParams(
            dimension_semantics=("parallel",),                # megacore sharding on v7x
        ),
    )(xt, g2d)

    return out_t[:, :rows].T.reshape(orig_shape)


if __name__ == "__main__":
    # Module config: normalized_shape = 4, p = -1 (disabled), eps = 1e-10, bias = False.
    d = 4
    eps = 1e-10

    key = jax.random.PRNGKey(0)
    x = jax.random.normal(key, (2, 3, 4), dtype=jnp.float32)
    gamma = jnp.ones((d,), dtype=jnp.float32)  # nn.Parameter(torch.ones(4))

    out = jax.block_until_ready(rmsnorm(x, gamma, eps=eps))

    # Reference check in plain JAX (same math as the PyTorch forward).
    norm_x = jnp.sqrt(jnp.sum(x * x, axis=-1, keepdims=True))
    ref = gamma * (x / (norm_x * (d ** -0.5) + eps))
    assert out.shape == x.shape and out.dtype == x.dtype
    # Tolerance accommodates the EUP approximate reciprocal (sub-1e-2 rel. error).
    assert jnp.allclose(out, ref, atol=1e-2, rtol=1e-2), float(
        jnp.max(jnp.abs(out - ref)))
    print("KERNEL_OK")
</pallas_src>

<mosaic_0001>
module attributes {stable_mosaic.version = 11 : i64} {
  func.func @_rmsnorm_kernel(%arg0: i32, %arg1: memref<4x128xf32, #tpu.memory_space<vmem>>, %arg2: memref<4x1xf32, #tpu.memory_space<vmem>>, %arg3: memref<4x128xf32, #tpu.memory_space<vmem>>) attributes {dimension_semantics = [#tpu.dimension_semantics<parallel>], iteration_bounds = array<i64: 1>, scalar_prefetch = 0 : i64, scratch_operands = 0 : i64, tpu.core_type = #tpu.core_type<tc>, window_params = [{transform_indices = @transform_0, window_bounds = array<i64: 4, 128>}, {pipeline_mode = #tpu.pipeline_mode<synchronous>, transform_indices = @transform_1, window_bounds = array<i64: 4, 1>}, {transform_indices = @transform_2, window_bounds = array<i64: 4, 128>}]} {
    %c0 = arith.constant 0 : index
    %c0_0 = arith.constant 0 : index
    %0 = vector.load %arg1[%c0, %c0_0] : memref<4x128xf32, #tpu.memory_space<vmem>>, vector<4x128xf32>
    %c0_1 = arith.constant 0 : index
    %c0_2 = arith.constant 0 : index
    %1 = vector.load %arg2[%c0_1, %c0_2] : memref<4x1xf32, #tpu.memory_space<vmem>>, vector<4x1xf32>
    %2 = arith.mulf %0, %0 : vector<4x128xf32>
    %cst = arith.constant dense<0.000000e+00> : vector<128xf32>
    %3 = vector.multi_reduction <add>, %2, %cst [0] : vector<4x128xf32> to vector<128xf32>
    %4 = vector.shape_cast %3 : vector<128xf32> to vector<1x128xf32>
    %5 = math.sqrt %4 : vector<1x128xf32>
    %cst_3 = arith.constant 5.000000e-01 : f32
    %6 = vector.broadcast %cst_3 : f32 to vector<1x128xf32>
    %7 = arith.mulf %5, %6 : vector<1x128xf32>
    %cst_4 = arith.constant 1.000000e-10 : f32
    %8 = vector.broadcast %cst_4 : f32 to vector<1x128xf32>
    %9 = arith.addf %7, %8 : vector<1x128xf32>
    %10 = tpu.reciprocal %9 {approx = true} : vector<1x128xf32> -> vector<1x128xf32>
    %11 = vector.broadcast %10 : vector<1x128xf32> to vector<4x128xf32>
    %12 = arith.mulf %0, %11 : vector<4x128xf32>
    %13 = vector.broadcast %1 : vector<4x1xf32> to vector<4x128xf32>
    %14 = arith.mulf %12, %13 : vector<4x128xf32>
    %c0_5 = arith.constant 0 : index
    %c0_6 = arith.constant 0 : index
    %15 = vector.load %arg3[%c0_5, %c0_6] : memref<4x128xf32, #tpu.memory_space<vmem>>, vector<4x128xf32>
    tpu.vector_store %arg3[%c0_5, %c0_6], %14 {strides = array<i32>} : memref<4x128xf32, #tpu.memory_space<vmem>>, vector<4x128xf32>,
    return
  }
  func.func @transform_0(%arg0: i32) -> (i32, i32) {
    %c0_i32 = arith.constant 0 : i32
    %c0_i32_0 = arith.constant 0 : i32
    return %c0_i32, %arg0 : i32, i32
  }
  func.func @transform_1(%arg0: i32) -> (i32, i32) {
    %c0_i32 = arith.constant 0 : i32
    %c0_i32_0 = arith.constant 0 : i32
    %c0_i32_1 = arith.constant 0 : i32
    return %c0_i32, %c0_i32_0 : i32, i32
  }
  func.func @transform_2(%arg0: i32) -> (i32, i32) {
    %c0_i32 = arith.constant 0 : i32
    %c0_i32_0 = arith.constant 0 : i32
    return %c0_i32, %arg0 : i32, i32
  }
}

</mosaic_0001>

<bundles_post_ra>
// kernel: tpu_custom_call.1
= control target key start
LH: loop header
LB: loop body
LE: loop exit
PB: predicated region body
PF: predicated region fallthrough
CT: control target
= control target key end

     0   :  { %s121_s0 = inlined_call_operand.vmem [shape: f32[4,128], index: 0, kind: input, shape index: {}]   ;;  %s122_s1 = inlined_call_operand.vmem [shape: f32[4,1], index: 1, kind: input, shape index: {}]   ;;  %s123_s2 = inlined_call_operand.hbm [shape: f32[4,128], index: 2, kind: output, shape index: {}]  }
   0x1   :  { %v13_v0 = vld [vmem:[%s122_s1] sm:$0xf] }
   0x2   :  { %7 = vsyncpa [#allocation3], 0  ;;  %v95_v1 = vmov 0   ;;  %vm15_vm0 = vcmask 1043456   ;;  %v12_v2 = vld [vmem:[%s121_s0] sm:$0xf] }
   0x3   :  { %64 = vset.pattern.permute.xlu0 %v95_v1  ;;  %v14_v3 = vmul.f32 %v12_v2, %v12_v2  ;;  %s96_s0 = smov [#allocation2]   ;;  %s53_s15 = sshll.u32 %s123_s2, 4  ;;  %s54_s15 = int_to_ptr.hbm [resolvable:$true] %s53_s15 }
   0x4   :  { %41 = vperm.xlu0 %64, %v13_v0   ;;  %s51_s1 = sshll.u32 %s96_s0, 4  ;;  %s52_s1 = int_to_ptr.vmem [resolvable:$true] %s51_s1 }
   0x5   :  { %v16_v4 = vsel %vm15_vm0, %v14_v3, 0.0 }
   0x6   :  { %v17_v5 = vrot.slane %v16_v4, 4 }
   0x8   :  { %v18_v6 = vadd.f32 %v17_v5, %v16_v4 }
   0xa   :  { %v19_v7 = vrot.slane %v18_v6, 2 }
   0xc   :  { %v20_v8 = vadd.f32 %v19_v7, %v18_v6 }
   0xe   :  { %v21_v9 = vrot.slane %v20_v8, 1 }
  0x10   :  { %v22_v10 = vadd.f32 %v21_v9, %v20_v8 }
  0x12   :  { %65 = vrsqrt.f32 %v22_v10  ;;  %vm30_vm1 = vcmp.eq.f32.partialorder %v22_v10, inf  ;;  %v33_v18 = vand.u32 2147483648, %v22_v10  ;;  %vm32_vm2 = vcmp.eq.f32.partialorder %v22_v10, 0.0 }
  0x18   :  { %v66_v11 = vpop.eup %65 }
  0x19   :  { %v24_v12 = vmul.f32 %v66_v11, %v22_v10 }
  0x1b   :  { %v25_v13 = vmul.f32 %v66_v11, %v24_v12 }
  0x1d   :  { %v26_v14 = vmul.f32 0.5, %v25_v13 }
  0x1f   :  { %v27_v15 = vsub.f32 1.5, %v26_v14 }
  0x21   :  { %v28_v16 = vmul.f32 %v66_v11, %v27_v15 }
  0x23   :  { %v29_v17 = vmul.f32 %v28_v16, %v22_v10 }
  0x25   :  { %v31_v19 = vsel %vm30_vm1, %v22_v10, %v29_v17 }
  0x26   :  { %v34_v20 = vsel %vm32_vm2, %v33_v18, %v31_v19 }
  0x27   :  { %v35_v21 = vmul.f32 0.5, %v34_v20 }
  0x29   :  { %v36_v22 = vadd.f32 1e-10, %v35_v21 }
  0x2b   :  { %67 = vrcp.f32 %v36_v22 }
  0x31   :  { %v68_v23 = vpop.eup %67 }
  0x32   :  { %v38_v24 = vmul.f32 %v68_v23, %v12_v2 }
  0x76   :  { %v42_v25 = vpop.permute.xlu0 %41 }
  0x77   :  { %v44_v26 = vmul.f32 %v42_v25, %v38_v24 }
  0x79   :  { %45 = vst [vmem:[#allocation2] sm:$0xf] %v44_v26 }
  0x7a   :  { %56 = dma.vmem_to_hbm [thread:$0]  %s52_s1, 64, %s54_s15, [#allocation3]  }
  0x7b   :  { %93 = dma.done.wait [#allocation3], 64  }
  0x7c   :  { %94 = vsyncadd [#allocation3], 4294967232 }
  0x7d   :  { %61 = vsyncpa [#allocation3], 1 }

</bundles_post_ra>
